<compile_context>
chip_gen: v7x
topology: tpu7x:2x2x1
jax: 0.10.0
libtpu: 0.0.40
codegen_flags: <defaults>
</compile_context>

<pallas_src>
import functools

import jax
import jax.numpy as jnp
from jax.experimental import pallas as pl
from jax.experimental.pallas import tpu as pltpu


def _round_up(x, m):
    return ((x + m - 1) // m) * m


# ----------------------------------------------------------------------------
# Kernel
# ----------------------------------------------------------------------------
def gth_kernel(x_ref, w_ref, b_ref, o_ref, acc_ref, *, tn):
    """One (i, j, k) grid step of the fused gated-tanh projection.

    x_ref : [tm, tk]        activation tile
    w_ref : [tk, 2*tn]      packed weight tile = [W_nl block j | W_g block j]
    b_ref : [1, 2*tn]       packed bias tile   = [b_nl block j | b_g block j]
    o_ref : [tm, tn]        output tile (written only at k == last)
    acc_ref: [tm, 2*tn] f32 accumulator scratch (persists across k)
    """
    k = pl.program_id(2)

    @pl.when(k == 0)
    def _():
        acc_ref[...] = jnp.zeros_like(acc_ref)

    # Single wide matmul covering both the tanh and the sigmoid branch.
    acc_ref[...] += jnp.dot(
        x_ref[...], w_ref[...], preferred_element_type=jnp.float32
    )

    @pl.when(k == pl.num_programs(2) - 1)
    def _():
        acc = acc_ref[...] + b_ref[...]          # f32 epilogue (VPU-friendly)
        proj = jnp.tanh(acc[:, :tn])             # nonlinear branch
        gate = jax.nn.sigmoid(acc[:, tn:])       # gate branch
        o_ref[...] = (proj * gate).astype(o_ref.dtype)


# ----------------------------------------------------------------------------
# Wrapper
# ----------------------------------------------------------------------------
def _pack_branches(w_nl, b_nl, w_g, b_g, k_pad, n_pad, tn):
    """Pad to [k_pad, n_pad] and interleave per tn-wide column block:
    packed columns = [nl_blk0 | g_blk0 | nl_blk1 | g_blk1 | ...]."""
    K, N = w_nl.shape
    pw = lambda w: jnp.pad(w, ((0, k_pad - K), (0, n_pad - N)))
    pb = lambda b: jnp.pad(b, (0, n_pad - N))
    w_nl_p, w_g_p = pw(w_nl), pw(w_g)
    b_nl_p, b_g_p = pb(b_nl), pb(b_g)
    nb = n_pad // tn
    w_packed = jnp.stack(
        [w_nl_p.reshape(k_pad, nb, tn), w_g_p.reshape(k_pad, nb, tn)], axis=2
    ).reshape(k_pad, nb * 2 * tn)
    b_packed = jnp.stack(
        [b_nl_p.reshape(nb, tn), b_g_p.reshape(nb, tn)], axis=1
    ).reshape(1, nb * 2 * tn)
    return w_packed, b_packed


def gth_forward(x, w_nl, b_nl, w_g, b_g, *, tm=256, tn=512, tk=512):
    """x: [B, in_dim]; w_*: [in_dim, out_dim]; b_*: [out_dim]. Returns [B, out_dim].

    NOTE: Dropout is eval-mode (identity), matching module.eval() semantics.
    """
    B, K = x.shape
    N = w_nl.shape[1]

    # Clamp tiles to the (padded) problem size; keep HW alignment:
    # tm multiple of 8 (sublane), tn/tk multiples of 128 (lane).
    tm = min(tm, _round_up(B, 8))
    tn = min(tn, _round_up(N, 128))
    tk = min(tk, _round_up(K, 128))

    b_pad = _round_up(B, tm)
    n_pad = _round_up(N, tn)
    k_pad = _round_up(K, tk)

    x_p = jnp.pad(x, ((0, b_pad - B), (0, k_pad - K)))
    w_packed, b_packed = _pack_branches(w_nl, b_nl, w_g, b_g, k_pad, n_pad, tn)

    kernel = functools.partial(gth_kernel, tn=tn)

    out = pl.pallas_call(
        kernel,
        out_shape=jax.ShapeDtypeStruct((b_pad, n_pad), x.dtype),
        grid_spec=pltpu.PrefetchScalarGridSpec(
            num_scalar_prefetch=0,
            grid=(b_pad // tm, n_pad // tn, k_pad // tk),
            in_specs=[
                pl.BlockSpec((tm, tk), lambda i, j, k: (i, k)),       # x
                pl.BlockSpec((tk, 2 * tn), lambda i, j, k: (k, j)),   # packed W
                pl.BlockSpec((1, 2 * tn), lambda i, j, k: (0, j)),    # packed b
            ],
            out_specs=pl.BlockSpec((tm, tn), lambda i, j, k: (i, j)),
            scratch_shapes=[pltpu.VMEM((tm, 2 * tn), jnp.float32)],
        ),
        compiler_params=pltpu.CompilerParams(
            dimension_semantics=("parallel", "parallel", "arbitrary")
        ),
    )(x_p, w_packed, b_packed)

    return out[:B, :N]


# ----------------------------------------------------------------------------
# Weight-norm init glue (plain JAX) + reference
# ----------------------------------------------------------------------------
def make_weight_normed_linear(key, in_dim, out_dim):
    """Mimics weight_norm(nn.Linear(in_dim, out_dim), dim=None).

    Returns the effective weight transposed to [in_dim, out_dim] and bias
    [out_dim] so the kernel computes x @ W.
    """
    k_v, k_b, k_g = jax.random.split(key, 3)
    bound = 1.0 / jnp.sqrt(in_dim)
    v = jax.random.uniform(k_v, (out_dim, in_dim), jnp.float32, -bound, bound)
    b = jax.random.uniform(k_b, (out_dim,), jnp.float32, -bound, bound)
    # dim=None => scalar g; init to ||v||_F, perturbed so the reparam matters.
    g = jnp.linalg.norm(v) * (1.0 + 0.1 * jax.random.uniform(k_g, ()))
    w_eff = g * v / jnp.linalg.norm(v)           # [out_dim, in_dim]
    return w_eff.T, b                            # -> [in_dim, out_dim]


def gth_reference(x, w_nl, b_nl, w_g, b_g):
    proj = jnp.tanh(x @ w_nl + b_nl)
    gate = jax.nn.sigmoid(x @ w_g + b_g)
    return proj * gate


if __name__ == "__main__":
    # Small shapes consistent with the module's forward: x is [batch, in_dim].
    # (At these tiny shapes a Pallas call is mostly launch overhead; the kernel
    #  pays off once B / out_dim reach the hundreds-to-thousands range.)
    B, in_dim, out_dim = 8, 32, 32
    key = jax.random.PRNGKey(0)
    k_x, k_nl, k_g = jax.random.split(key, 3)

    x = jax.random.normal(k_x, (B, in_dim), jnp.float32)
    w_nl, b_nl = make_weight_normed_linear(k_nl, in_dim, out_dim)
    w_g, b_g = make_weight_normed_linear(k_g, in_dim, out_dim)

    out = gth_forward(x, w_nl, b_nl, w_g, b_g)
    out = jax.block_until_ready(out)

    ref = gth_reference(x, w_nl, b_nl, w_g, b_g)
    assert out.shape == (B, out_dim)
    assert jnp.allclose(out, ref, atol=1e-5, rtol=1e-5), "mismatch vs reference"

    print("KERNEL_OK")
</pallas_src>

<mosaic_0001>
module attributes {stable_mosaic.version = 11 : i64} {
  func.func @gth_kernel(%arg0: i32, %arg1: i32, %arg2: i32, %arg3: memref<8x128xf32, #tpu.memory_space<vmem>>, %arg4: memref<128x256xf32, #tpu.memory_space<vmem>>, %arg5: memref<1x256xf32, #tpu.memory_space<vmem>>, %arg6: memref<8x128xf32, #tpu.memory_space<vmem>>, %arg7: memref<8x256xf32, #tpu.memory_space<vmem>>) attributes {dimension_semantics = [#tpu.dimension_semantics<parallel>, #tpu.dimension_semantics<parallel>, #tpu.dimension_semantics<arbitrary>], iteration_bounds = array<i64: 1, 1, 1>, scalar_prefetch = 0 : i64, scratch_operands = 1 : i64, tpu.core_type = #tpu.core_type<tc>, window_params = [{transform_indices = @transform_0, window_bounds = array<i64: 8, 128>}, {transform_indices = @transform_1, window_bounds = array<i64: 128, 256>}, {transform_indices = @transform_2, window_bounds = array<i64: 1, 256>}, {transform_indices = @transform_3, window_bounds = array<i64: 8, 128>}]} {
    %c0_i32 = arith.constant 0 : i32
    %0 = arith.cmpi eq, %arg2, %c0_i32 : i32
    %1 = arith.extui %0 : i1 to i32
    %c0_i32_0 = arith.constant 0 : i32
    %2 = arith.cmpi ne, %1, %c0_i32_0 : i32
    scf.if %2 {
      %cst_10 = arith.constant 0.000000e+00 : f32
      %12 = vector.broadcast %cst_10 : f32 to vector<8x256xf32>
      %c0_11 = arith.constant 0 : index
      %c0_12 = arith.constant 0 : index
      %13 = vector.load %arg7[%c0_11, %c0_12] : memref<8x256xf32, #tpu.memory_space<vmem>>, vector<8x256xf32>
      tpu.vector_store %arg7[%c0_11, %c0_12], %12 {strides = array<i32>} : memref<8x256xf32, #tpu.memory_space<vmem>>, vector<8x256xf32>,
    } else {
    }
    %c0 = arith.constant 0 : index
    %c0_1 = arith.constant 0 : index
    %3 = vector.load %arg7[%c0, %c0_1] : memref<8x256xf32, #tpu.memory_space<vmem>>, vector<8x256xf32>
    %c0_2 = arith.constant 0 : index
    %c0_3 = arith.constant 0 : index
    %4 = vector.load %arg3[%c0_2, %c0_3] : memref<8x128xf32, #tpu.memory_space<vmem>>, vector<8x128xf32>
    %c0_4 = arith.constant 0 : index
    %c0_5 = arith.constant 0 : index
    %5 = vector.load %arg4[%c0_4, %c0_5] : memref<128x256xf32, #tpu.memory_space<vmem>>, vector<128x256xf32>
    %cst = arith.constant dense<0.000000e+00> : vector<8x256xf32>
    %6 = tpu.matmul %4, %5, %cst {dimension_numbers = #tpu.dot_dimension_numbers<[1], [0], [0], [1], [0, 0, 1, 1], [], []>} : vector<8x128xf32>, vector<128x256xf32>, vector<8x256xf32> -> vector<8x256xf32>
    %7 = arith.addf %3, %6 : vector<8x256xf32>
    %c0_6 = arith.constant 0 : index
    %c0_7 = arith.constant 0 : index
    %8 = vector.load %arg7[%c0_6, %c0_7] : memref<8x256xf32, #tpu.memory_space<vmem>>, vector<8x256xf32>
    tpu.vector_store %arg7[%c0_6, %c0_7], %7 {strides = array<i32>} : memref<8x256xf32, #tpu.memory_space<vmem>>, vector<8x256xf32>,
    %c0_i32_8 = arith.constant 0 : i32
    %9 = arith.cmpi eq, %arg2, %c0_i32_8 : i32
    %10 = arith.extui %9 : i1 to i32
    %c0_i32_9 = arith.constant 0 : i32
    %11 = arith.cmpi ne, %10, %c0_i32_9 : i32
    scf.if %11 {
      %c0_10 = arith.constant 0 : index
      %c0_11 = arith.constant 0 : index
      %12 = vector.load %arg7[%c0_10, %c0_11] : memref<8x256xf32, #tpu.memory_space<vmem>>, vector<8x256xf32>
      %c0_12 = arith.constant 0 : index
      %c0_13 = arith.constant 0 : index
      %13 = vector.load %arg5[%c0_12, %c0_13] : memref<1x256xf32, #tpu.memory_space<vmem>>, vector<1x256xf32>
      %14 = vector.broadcast %13 : vector<1x256xf32> to vector<8x256xf32>
      %15 = arith.addf %12, %14 : vector<8x256xf32>
      %16 = vector.extract_strided_slice %15 {offsets = [0, 0], sizes = [8, 128], strides = [1, 1]} : vector<8x256xf32> to vector<8x128xf32>
      %17 = math.tanh %16 : vector<8x128xf32>
      %18 = vector.extract_strided_slice %15 {offsets = [0, 128], sizes = [8, 128], strides = [1, 1]} : vector<8x256xf32> to vector<8x128xf32>
      %19 = arith.negf %18 : vector<8x128xf32>
      %20 = math.exp %19 : vector<8x128xf32>
      %cst_14 = arith.constant 1.000000e+00 : f32
      %21 = vector.broadcast %cst_14 : f32 to vector<8x128xf32>
      %22 = arith.addf %21, %20 : vector<8x128xf32>
      %23 = arith.divf %21, %22 : vector<8x128xf32>
      %24 = arith.mulf %17, %23 : vector<8x128xf32>
      %c0_15 = arith.constant 0 : index
      %c0_16 = arith.constant 0 : index
      %25 = vector.load %arg6[%c0_15, %c0_16] : memref<8x128xf32, #tpu.memory_space<vmem>>, vector<8x128xf32>
      tpu.vector_store %arg6[%c0_15, %c0_16], %24 {strides = array<i32>} : memref<8x128xf32, #tpu.memory_space<vmem>>, vector<8x128xf32>,
    } else {
    }
    return
  }
  func.func @transform_0(%arg0: i32, %arg1: i32, %arg2: i32) -> (i32, i32) {
    %c0_i32 = arith.constant 0 : i32
    return %arg0, %arg2 : i32, i32
  }
  func.func @transform_1(%arg0: i32, %arg1: i32, %arg2: i32) -> (i32, i32) {
    %c0_i32 = arith.constant 0 : i32
    return %arg2, %arg1 : i32, i32
  }
  func.func @transform_2(%arg0: i32, %arg1: i32, %arg2: i32) -> (i32, i32) {
    %c0_i32 = arith.constant 0 : i32
    %c0_i32_0 = arith.constant 0 : i32
    return %c0_i32, %arg1 : i32, i32
  }
  func.func @transform_3(%arg0: i32, %arg1: i32, %arg2: i32) -> (i32, i32) {
    %c0_i32 = arith.constant 0 : i32
    return %arg0, %arg1 : i32, i32
  }
}

</mosaic_0001>

<bundles_post_ra>
// kernel: tpu_custom_call.1
= control target key start
LH: loop header
LB: loop body
LE: loop exit
PB: predicated region body
PF: predicated region fallthrough
CT: control target
= control target key end

     0   :  { %8 = vsyncpa [#allocation4], 0  ;;  %s390_s0 = inlined_call_operand.hbm [shape: f32[8,128], index: 0, kind: input, shape index: {}]   ;;  %s391_s1 = inlined_call_operand.hbm [shape: f32[128,256], index: 1, kind: input, shape index: {}]   ;;  %s392_s2 = inlined_call_operand.vmem [shape: f32[1,256], index: 2, kind: input, shape index: {}]   ;;  %s393_s3 = inlined_call_operand.hbm [shape: f32[8,128], index: 3, kind: output, shape index: {}]  }
   0x1   :  { %9 = vsyncpa [#allocation7], 0 }
   0x2   :  { %10 = vsyncpa [#allocation5], 0  ;;  %s318_s12 = smov [#allocation3]   ;;  %s319_s14 = smov [#allocation6]  }
   0x3   :  { %s17_s13 = sshll.u32 %s318_s12, 4  ;;  %s26_s15 = sshll.u32 %s319_s14, 4  ;;  %s18_s13 = int_to_ptr.vmem [resolvable:$true] %s17_s13  ;;  %s344_s15 = int_to_ptr.vmem [resolvable:$true] %s26_s15 }
   0x4   :  { %s246_s18 = scalar_lea.hbm %s390_s0, 128 }
   0x5   :  { %p247_p0 = scmp.ne.s32.totalorder %s390_s0, %s246_s18  ;;  %p250_p1 = scmp.lt.u32.totalorder %s246_s18, %s390_s0 }
   0x7   :  { %p252_p2 = pnand %p250_p1, %p247_p0 }
   0x9   :  { %255 = shalt.err (!%p252_p2)
}
   0xa   :  { %s256_s23 = scalar_lea.vmem %s18_s13, 128  ;;  %p261_p4 = scmp.lt.s32.totalorder %s18_s13, %s18_s13 }
   0xb   :  { %p257_p3 = scmp.ne.s32.totalorder %s18_s13, %s256_s23  ;;  %p262_p5 = scmp.lt.s32.totalorder %s256_s23, %s256_s23 }
   0xd   :  { %p263_p6 = por %p262_p5, %p261_p4 }
   0xf   :  { %p264_p7 = pnand %p263_p6, %p257_p3 }
  0x11   :  { %267 = shalt.err (!%p264_p7)
}
  0x12   :  { %20 = dma.hbm_to_vmem [thread:$0]  %s390_s0, 128, %s18_s13, [#allocation4]  }
  0x13   :  { %s268_s28 = scalar_lea.hbm %s391_s1, 4096 }
  0x14   :  { %p269_p8 = scmp.ne.s32.totalorder %s391_s1, %s268_s28  ;;  %p272_p9 = scmp.lt.u32.totalorder %s268_s28, %s391_s1 }
  0x16   :  { %p274_p10 = pnand %p272_p9, %p269_p8 }
  0x18   :  { %277 = shalt.err (!%p274_p10)
}
  0x19   :  { %s278_s6 = scalar_lea.vmem %s344_s15, 4096  ;;  %p283_p12 = scmp.lt.s32.totalorder %s344_s15, %s344_s15 }
  0x1a   :  { %p279_p11 = scmp.ne.s32.totalorder %s344_s15, %s278_s6  ;;  %p284_p13 = scmp.lt.s32.totalorder %s278_s6, %s278_s6 }
  0x1c   :  { %p285_p0 = por %p284_p13, %p283_p12 }
  0x1e   :  { %p286_p1 = pnand %p285_p0, %p279_p11 }
  0x20   :  { %289 = shalt.err (!%p286_p1)
}
  0x21   :  { %s320_s0 = smov 256   ;;  %s321_s7 = smov 16  }
  0x22   :  { %32 = dma.hbm_to_vmem [thread:$0]  %s391_s1, 4096, %s344_s15, [#allocation7], %s320_s0, %s320_s0, %s321_s7  }
  0x23   :  { %312 = dma.done.wait [#allocation4], 128  }
  0x24   :  { %313 = vsyncadd [#allocation4], 4294967168 }
  0x25   :  { %314 = dma.done.wait [#allocation7], 4096  }
  0x26   :  { %315 = vsyncadd [#allocation7], 4294963200  ;;  %v322_v0 = vmov 0.0   ;;  %v51_v1 = vld [vmem:[#allocation6 + $0x8] sm:$0xff]  ;;  %v53_v2 = vld [vmem:[#allocation6 + $0x18] sm:$0xff]  ;;  %v164_v50 = vlaneseq  ;;  %s323_s11 = smov [#allocation8]  }
  0x27   :  { %146 = vmatprep.mubr.f32.mxu0 %v322_v0  ;;  %v50_v3 = vld [vmem:[#allocation6] sm:$0xff]  ;;  %v202_v4 = vpack.c.bf16 %v53_v2, %v51_v1  ;;  %v52_v5 = vld [vmem:[#allocation6 + $0x10] sm:$0xff]  ;;  %v55_v6 = vld [vmem:[#allocation6 + $0x28] sm:$0xff]  ;;  %s191_s12 = sshll.u32 %s323_s11, 4  ;;  %s192_s12 = int_to_ptr.vmem [resolvable:$true] %s191_s12 }
  0x28   :  { %v57_v7 = vld [vmem:[#allocation6 + $0x38] sm:$0xff]  ;;  %v204_v8 = vpack.c.bf16 %v52_v5, %v50_v3  ;;  %v54_v10 = vld [vmem:[#allocation6 + $0x20] sm:$0xff]  ;;  %v56_v11 = vld [vmem:[#allocation6 + $0x30] sm:$0xff]  ;;  %v165_v51 = vshrl.u32 %v164_v50, 7  ;;  %p295_p3 = scmp.lt.s32.totalorder %s192_s12, %s192_s12 }
  0x29   :  { %v206_v9 = vpack.c.bf16 %v57_v7, %v55_v6  ;;  %v59_v12 = vld [vmem:[#allocation6 + $0x48] sm:$0xff]  ;;  %203 = vmatprep.subr.bf16.mxu0 %v202_v4  ;;  %v61_v13 = vld [vmem:[#allocation6 + $0x58] sm:$0xff]  ;;  %v208_v14 = vpack.c.bf16 %v56_v11, %v54_v10  ;;  %v58_v16 = vld [vmem:[#allocation6 + $0x40] sm:$0xff] }
  0x2a   :  { %205 = vmatpush1.bf16.msra.mxu0 %v204_v8  ;;  %v210_v15 = vpack.c.bf16 %v61_v13, %v59_v12  ;;  %v60_v17 = vld [vmem:[#allocation6 + $0x50] sm:$0xff]  ;;  %v63_v18 = vld [vmem:[#allocation6 + $0x68] sm:$0xff]  ;;  %v65_v19 = vld [vmem:[#allocation6 + $0x78] sm:$0xff]  ;;  %v170_v52 = vsub.s32 1, %v165_v51  ;;  %v166_v59 = vsub.s32 0, %v165_v51 }
  0x2b   :  { %207 = vmatprep.subr.bf16.mxu0 %v206_v9  ;;  %v212_v20 = vpack.c.bf16 %v60_v17, %v58_v16  ;;  %v214_v21 = vpack.c.bf16 %v65_v19, %v63_v18  ;;  %v62_v22 = vld [vmem:[#allocation6 + $0x60] sm:$0xff]  ;;  %v64_v23 = vld [vmem:[#allocation6 + $0x70] sm:$0xff]  ;;  %v67_v24 = vld [vmem:[#allocation6 + $0x88] sm:$0xff] }
  0x2c   :  { %v69_v25 = vld [vmem:[#allocation6 + $0x98] sm:$0xff]  ;;  %v216_v26 = vpack.c.bf16 %v64_v23, %v62_v22  ;;  %v66_v28 = vld [vmem:[#allocation6 + $0x80] sm:$0xff]  ;;  %v68_v29 = vld [vmem:[#allocation6 + $0x90] sm:$0xff] }
  0x2d   :  { %v218_v27 = vpack.c.bf16 %v69_v25, %v67_v24  ;;  %v71_v30 = vld [vmem:[#allocation6 + $0xa8] sm:$0xff]  ;;  %v73_v31 = vld [vmem:[#allocation6 + $0xb8] sm:$0xff]  ;;  %v220_v32 = vpack.c.bf16 %v68_v29, %v66_v28  ;;  %v70_v34 = vld [vmem:[#allocation6 + $0xa0] sm:$0xff] }
  0x2e   :  { %209 = vmatpush1.bf16.msra.mxu0 %v208_v14  ;;  %v222_v33 = vpack.c.bf16 %v73_v31, %v71_v30  ;;  %v72_v35 = vld [vmem:[#allocation6 + $0xb0] sm:$0xff]  ;;  %v75_v36 = vld [vmem:[#allocation6 + $0xc8] sm:$0xff]  ;;  %v77_v37 = vld [vmem:[#allocation6 + $0xd8] sm:$0xff] }
  0x2f   :  { %211 = vmatprep.subr.bf16.mxu0 %v210_v15  ;;  %v224_v38 = vpack.c.bf16 %v72_v35, %v70_v34  ;;  %v226_v39 = vpack.c.bf16 %v77_v37, %v75_v36  ;;  %v74_v40 = vld [vmem:[#allocation6 + $0xc0] sm:$0xff]  ;;  %v76_v41 = vld [vmem:[#allocation6 + $0xd0] sm:$0xff]  ;;  %v79_v42 = vld [vmem:[#allocation6 + $0xe8] sm:$0xff] }
  0x30   :  { %v81_v43 = vld [vmem:[#allocation6 + $0xf8] sm:$0xff]  ;;  %v228_v44 = vpack.c.bf16 %v76_v41, %v74_v40  ;;  %v78_v46 = vld [vmem:[#allocation6 + $0xe0] sm:$0xff]  ;;  %v80_v47 = vld [vmem:[#allocation6 + $0xf0] sm:$0xff] }
  0x31   :  { %v230_v45 = vpack.c.bf16 %v81_v43, %v79_v42  ;;  %v232_v48 = vpack.c.bf16 %v80_v47, %v78_v46  ;;  %v49_v49 = vld [vmem:[#allocation3] sm:$0xff] }
  0x32   :  { %213 = vmatpush1.bf16.msra.mxu0 %v212_v20  ;;  %v162_v53 = vld [vmem:[%s392_s2] sm:$0x3]  ;;  %s290_s2 = scalar_lea.vmem %s192_s12, 128 }
  0x33   :  { %215 = vmatprep.subr.bf16.mxu0 %v214_v21  ;;  %v171_v54 = vrot.slane %v162_v53, %v170_v52  ;;  %v167_v60 = vrot.slane %v162_v53, %v166_v59  ;;  %p291_p2 = scmp.ne.s32.totalorder %s192_s12, %s290_s2  ;;  %p296_p4 = scmp.lt.s32.totalorder %s290_s2, %s290_s2 }
  0x35   :  { %p297_p5 = por %p296_p4, %p295_p3 }
  0x36   :  { %217 = vmatpush1.bf16.msra.mxu0 %v216_v26 }
  0x37   :  { %219 = vmatprep.subr.bf16.mxu0 %v218_v27  ;;  %p298_p6 = pnand %p297_p5, %p291_p2 }
  0x3a   :  { %221 = vmatpush1.bf16.msra.mxu0 %v220_v32 }
  0x3b   :  { %223 = vmatprep.subr.bf16.mxu0 %v222_v33 }
  0x3e   :  { %225 = vmatpush1.bf16.msra.mxu0 %v224_v38 }
  0x3f   :  { %227 = vmatprep.subr.bf16.mxu0 %v226_v39 }
  0x42   :  { %229 = vmatpush1.bf16.msra.mxu0 %v228_v44 }
  0x43   :  { %231 = vmatprep.subr.bf16.mxu0 %v230_v45 }
  0x46   :  { %233 = vmatpush1.bf16.msra.mxu0 %v232_v48 }
  0x49   :  { %147 = vmatmul.mubr.f32.vlgmr.msra.gmra.mrb[0].mxu0 %v49_v49 }
 0x11c   :  { %v148_v55 = vpop.f32.mrb[0].mxu0 }
 0x11d   :  { %v150_v56 = vpop.f32.mrb[1].mxu0  ;;  %v174_v61 = vadd.f32 %v167_v60, %v148_v55 }
 0x11e   :  { %v175_v57 = vadd.f32 %v171_v54, %v150_v56 }
 0x120   :  { %v201_v58 = vmul.f32 -1.442695, %v175_v57 }
 0x122   :  { %240 = vpow2.f32 %v201_v58 }
 0x123   :  { %242 = vtanh.f32 %v174_v61 }
 0x12c   :  { %v241_v62 = vpop.eup %240 }
 0x12d   :  { %v180_v63 = vadd.f32 1.0, %v241_v62  ;;  %v243_v0 = vpop.eup %242 }
 0x12f   :  { %244 = vrcp.f32 %v180_v63 }
 0x139   :  { %v245_v1 = vpop.eup %244 }
 0x13a   :  { %v183_v2 = vmul.f32 %v245_v1, %v243_v0 }
 0x13c   :  { %184 = vst [vmem:[#allocation8] sm:$0xff] %v183_v2 }
 0x13d   :  { %301 = shalt.err (!%p298_p6)
}
 0x13e   :  { %s302_s15 = scalar_lea.hbm %s393_s3, 128 }
 0x13f   :  { %p303_p7 = scmp.ne.s32.totalorder %s393_s3, %s302_s15  ;;  %p306_p8 = scmp.lt.u32.totalorder %s302_s15, %s393_s3 }
 0x141   :  { %p308_p9 = pnand %p306_p8, %p303_p7 }
 0x143   :  { %311 = shalt.err (!%p308_p9)
}
 0x144   :  { %194 = dma.vmem_to_hbm [thread:$0]  %s192_s12, 128, %s393_s3, [#allocation5]  }
 0x145   :  { %316 = dma.done.wait [#allocation5], 128  }
 0x146   :  { %317 = vsyncadd [#allocation5], 4294967168 }
 0x147   :  { %198 = vsyncpa [#allocation4], 1 }
 0x148   :  { %199 = vsyncpa [#allocation7], 1 }
 0x149   :  { %200 = vsyncpa [#allocation5], 1 }

</bundles_post_ra>
